<compile_context>
chip_gen: v5e
topology: v5e:2x2
jax: 0.10.0
libtpu: 0.0.40
codegen_flags: <defaults>
</compile_context>

<pallas_src>
import functools

import jax
import jax.numpy as jnp
from jax.experimental import pallas as pl
from jax.experimental.pallas import tpu as pltpu

BN_EPS = 1e-5


def _upsample_block_kernel(w_ref, x_ref, p_ref, o_ref):
    # Conv as a single lane-dense MXU matmul: [C_out, K] @ [K, M] -> [C_out, M].
    # Conv bias intentionally omitted: training-mode BN mean-subtraction cancels it.
    y = jnp.dot(w_ref[...], x_ref[...], preferred_element_type=jnp.float32)

    # BatchNorm2d training-mode stats per channel (= per row), both moments from the
    # same resident tile; biased variance via E[y^2] - mean^2.
    inv_m = jnp.float32(1.0 / y.shape[1])
    mean = jnp.sum(y, axis=1, keepdims=True) * inv_m
    mean_sq = jnp.sum(y * y, axis=1, keepdims=True) * inv_m
    var = mean_sq - mean * mean

    gamma = p_ref[:, 0:1]   # BN weight
    beta = p_ref[:, 1:2]    # BN bias
    alpha = p_ref[:, 2:3]   # PReLU shared alpha (num_parameters=1), replicated per row

    # BN folded into one per-channel FMA; rsqrt runs on the EUP slot.
    scale = gamma * jax.lax.rsqrt(var + BN_EPS)
    shift = beta - scale * mean
    z = y * scale + shift

    # PReLU (shared alpha -> commutes with the pixel-shuffle permutation done outside).
    o_ref[...] = jnp.where(z > 0.0, z, alpha * z)


def upsample_block_forward(x_nchw, weight, bias, gamma, beta, alpha,
                           stride=1, padding=1):
    del bias  # exactly cancelled by training-mode BatchNorm mean subtraction
    N, C_in, H, W = x_nchw.shape
    C_out, _, KH, KW = weight.shape

    # ---- im2col in the transposed layout (rows = (kh, kw, ci), cols = (n, oh, ow)) ----
    x_cnhw = jnp.transpose(x_nchw, (1, 0, 2, 3))                       # [C_in, N, H, W]
    x_pad = jnp.pad(x_cnhw, ((0, 0), (0, 0),
                             (padding, padding), (padding, padding)))
    Hp, Wp = H + 2 * padding, W + 2 * padding
    oh = (Hp - KH) // stride + 1
    ow = (Wp - KW) // stride + 1
    M = N * oh * ow
    K = KH * KW * C_in

    cols = []
    for i in range(KH):
        for j in range(KW):
            cols.append(x_pad[:, :, i:i + stride * oh:stride,
                              j:j + stride * ow:stride])
    patches_t = jnp.stack(cols, axis=0).reshape(K, M)                  # [K, M]

    # PyTorch OIHW weight -> [C_out, KH, KW, C_in] -> [C_out, K] matching patch ordering.
    w_t = jnp.transpose(weight, (0, 2, 3, 1)).reshape(C_out, K)

    # Pack all per-channel params into one VMEM input: [gamma | beta | alpha] per row.
    a = jnp.broadcast_to(jnp.reshape(alpha, (1,)).astype(jnp.float32), (C_out,))
    params = jnp.stack([gamma.astype(jnp.float32),
                        beta.astype(jnp.float32), a], axis=1)          # [C_out, 3]

    vmem = pl.BlockSpec(memory_space=pltpu.MemorySpace.VMEM)
    out = pl.pallas_call(
        _upsample_block_kernel,
        out_shape=jax.ShapeDtypeStruct((C_out, M), jnp.float32),       # lane-dense [8, 512]
        in_specs=[vmem, vmem, vmem],
        out_specs=vmem,
    )(w_t, patches_t, params)

    # ---- PixelShuffle(2): kernel output is [(c2, r1, r2), (n, oh, ow)] ----
    # Single 6-D transpose to NCHW [n, c2, oh, r1, ow, r2], then flatten spatial dims.
    r = 2
    c2 = C_out // (r * r)
    y = out.reshape(c2, r, r, N, oh, ow)
    y = jnp.transpose(y, (3, 0, 4, 1, 5, 2))
    return y.reshape(N, c2, oh * r, ow * r)


def reference_forward(x, weight, bias, gamma, beta, alpha, stride=1, padding=1):
    """Pure-JAX reference matching PyTorch forward semantics (keeps the conv bias)."""
    y = jax.lax.conv_general_dilated(
        x, weight, window_strides=(stride, stride),
        padding=[(padding, padding), (padding, padding)],
        dimension_numbers=("NCHW", "OIHW", "NCHW"),
        precision=jax.lax.Precision.HIGHEST)
    y = y + bias.reshape(1, -1, 1, 1)
    mean = jnp.mean(y, axis=(0, 2, 3), keepdims=True)
    var = jnp.mean(jnp.square(y - mean), axis=(0, 2, 3), keepdims=True)
    z = (gamma.reshape(1, -1, 1, 1) * (y - mean) * jax.lax.rsqrt(var + BN_EPS)
         + beta.reshape(1, -1, 1, 1))
    N, C, Hc, Wc = z.shape
    r = 2
    c2 = C // (r * r)
    z = z.reshape(N, c2, r, r, Hc, Wc).transpose(0, 1, 4, 2, 5, 3)
    z = z.reshape(N, c2, Hc * r, Wc * r)
    a = jnp.reshape(alpha, ())
    return jnp.where(z > 0, z, a * z)


if __name__ == "__main__":
    key = jax.random.PRNGKey(0)
    k1, k2, k3, k4, k5 = jax.random.split(key, 5)

    # _UpsampleBlock(in_channels=4, out_channels=8, kernel_size=3, stride=1, padding=1)
    N, C_in, H, W = 2, 4, 16, 16
    C_out, KH, KW = 8, 3, 3
    stride, padding = 1, 1

    x = jax.random.normal(k1, (N, C_in, H, W), jnp.float32)
    weight = 0.1 * jax.random.normal(k2, (C_out, C_in, KH, KW), jnp.float32)
    bias = 0.1 * jax.random.normal(k3, (C_out,), jnp.float32)
    gamma = 1.0 + 0.1 * jax.random.normal(k4, (C_out,), jnp.float32)   # BN weight
    beta = 0.1 * jax.random.normal(k5, (C_out,), jnp.float32)          # BN bias
    alpha = jnp.full((1,), 0.25, dtype=jnp.float32)                    # PReLU default init

    fwd = jax.jit(upsample_block_forward, static_argnames=("stride", "padding"))
    out = fwd(x, weight, bias, gamma, beta, alpha, stride=stride, padding=padding)
    out = jax.block_until_ready(out)

    ref = reference_forward(x, weight, bias, gamma, beta, alpha,
                            stride=stride, padding=padding)
    assert out.shape == (N, C_out // 4, H * 2, W * 2), out.shape
    # Tightened from 1e-2 -> 1e-3: expected f32 numerical noise (MXU f32 path +
    # different reduction orders between the fused single-pass BN stats and the
    # conv-based reference) is ~1e-6..1e-5, while layout/ordering bugs are O(1).
    err = float(jnp.max(jnp.abs(out - ref)))
    assert err < 1e-3, err

    print("KERNEL_OK")
</pallas_src>

<mosaic_0001>
module attributes {stable_mosaic.version = 11 : i64} {
  func.func @_upsample_block_kernel(%arg0: memref<8x36xf32, #tpu.memory_space<vmem>>, %arg1: memref<36x512xf32, #tpu.memory_space<vmem>>, %arg2: memref<8x3xf32, #tpu.memory_space<vmem>>, %arg3: memref<8x512xf32, #tpu.memory_space<vmem>>) attributes {dimension_semantics = [], scalar_prefetch = 0 : i64, scratch_operands = 0 : i64, tpu.core_type = #tpu.core_type<tc>} {
    %c0 = arith.constant 0 : index
    %c0_0 = arith.constant 0 : index
    %0 = vector.load %arg0[%c0, %c0_0] : memref<8x36xf32, #tpu.memory_space<vmem>>, vector<8x36xf32>
    %c0_1 = arith.constant 0 : index
    %c0_2 = arith.constant 0 : index
    %1 = vector.load %arg1[%c0_1, %c0_2] : memref<36x512xf32, #tpu.memory_space<vmem>>, vector<36x512xf32>
    %cst = arith.constant dense<0.000000e+00> : vector<8x512xf32>
    %2 = tpu.matmul %0, %1, %cst {dimension_numbers = #tpu.dot_dimension_numbers<[1], [0], [0], [1], [0, 0, 1, 1], [], []>} : vector<8x36xf32>, vector<36x512xf32>, vector<8x512xf32> -> vector<8x512xf32>
    %cst_3 = arith.constant dense<0.000000e+00> : vector<8xf32>
    %3 = vector.multi_reduction <add>, %2, %cst_3 [1] : vector<8x512xf32> to vector<8xf32>
    %4 = vector.shape_cast %3 : vector<8xf32> to vector<8x1xf32>
    %cst_4 = arith.constant 0.001953125 : f32
    %5 = vector.broadcast %cst_4 : f32 to vector<8x1xf32>
    %6 = arith.mulf %4, %5 : vector<8x1xf32>
    %7 = arith.mulf %2, %2 : vector<8x512xf32>
    %cst_5 = arith.constant dense<0.000000e+00> : vector<8xf32>
    %8 = vector.multi_reduction <add>, %7, %cst_5 [1] : vector<8x512xf32> to vector<8xf32>
    %9 = vector.shape_cast %8 : vector<8xf32> to vector<8x1xf32>
    %cst_6 = arith.constant 0.001953125 : f32
    %10 = vector.broadcast %cst_6 : f32 to vector<8x1xf32>
    %11 = arith.mulf %9, %10 : vector<8x1xf32>
    %12 = arith.mulf %6, %6 : vector<8x1xf32>
    %13 = arith.subf %11, %12 : vector<8x1xf32>
    %c0_7 = arith.constant 0 : index
    %c0_8 = arith.constant 0 : index
    %14 = vector.load %arg2[%c0_7, %c0_8] : memref<8x3xf32, #tpu.memory_space<vmem>>, vector<8x1xf32>
    %c0_9 = arith.constant 0 : index
    %c1 = arith.constant 1 : index
    %15 = vector.load %arg2[%c0_9, %c1] : memref<8x3xf32, #tpu.memory_space<vmem>>, vector<8x1xf32>
    %c0_10 = arith.constant 0 : index
    %c2 = arith.constant 2 : index
    %16 = vector.load %arg2[%c0_10, %c2] : memref<8x3xf32, #tpu.memory_space<vmem>>, vector<8x1xf32>
    %cst_11 = arith.constant 9.99999974E-6 : f32
    %17 = vector.broadcast %cst_11 : f32 to vector<8x1xf32>
    %18 = arith.addf %13, %17 : vector<8x1xf32>
    %19 = math.rsqrt %18 : vector<8x1xf32>
    %20 = arith.mulf %14, %19 : vector<8x1xf32>
    %21 = arith.mulf %20, %6 : vector<8x1xf32>
    %22 = arith.subf %15, %21 : vector<8x1xf32>
    %23 = vector.broadcast %20 : vector<8x1xf32> to vector<8x512xf32>
    %24 = arith.mulf %2, %23 : vector<8x512xf32>
    %25 = vector.broadcast %22 : vector<8x1xf32> to vector<8x512xf32>
    %26 = arith.addf %24, %25 : vector<8x512xf32>
    %cst_12 = arith.constant 0.000000e+00 : f32
    %27 = vector.broadcast %cst_12 : f32 to vector<8x512xf32>
    %28 = arith.cmpf ogt, %26, %27 : vector<8x512xf32>
    %29 = vector.broadcast %16 : vector<8x1xf32> to vector<8x512xf32>
    %30 = arith.mulf %29, %26 : vector<8x512xf32>
    %31 = arith.select %28, %26, %30 : vector<8x512xi1>, vector<8x512xf32>
    %c0_13 = arith.constant 0 : index
    %c0_14 = arith.constant 0 : index
    %32 = vector.load %arg3[%c0_13, %c0_14] : memref<8x512xf32, #tpu.memory_space<vmem>>, vector<8x512xf32>
    tpu.vector_store %arg3[%c0_13, %c0_14], %31 {strides = array<i32>} : memref<8x512xf32, #tpu.memory_space<vmem>>, vector<8x512xf32>,
    return
  }
}

</mosaic_0001>

<bundles_post_ra>
// kernel: upsample_block_forward.1
= control target key start
LH: loop header
LB: loop body
LE: loop exit
PB: predicated region body
PF: predicated region fallthrough
CT: control target
= control target key end

     0   :  { %vm39_vm0 = vcmask 1043456   ;;  %vm35_vm1 = vcmask 293888   ;;  %v230_v37 = vmov 0   ;;  %s231_s27 = smov 1   ;;  %v232_v53 = vmov 1   ;;  %s332_s1 = inlined_call_operand.vmem [shape: f32[36,512], index: 1, kind: input, shape index: {}]   ;;  %s333_s0 = inlined_call_operand.vmem [shape: f32[8,36], index: 0, kind: input, shape index: {}]   ;;  %s334_s2 = inlined_call_operand.vmem [shape: f32[8,3], index: 2, kind: input, shape index: {}]   ;;  %s335_s3 = inlined_call_operand.vmem [shape: f32[8,512], index: 3, kind: output, shape index: {}]  }
   0x1   :  { %v33_v0 = vld [vmem:[%s332_s1 + $0x90] sm:$0xf]  ;;  %v34_v2 = vld [vmem:[%s332_s1 + $0x98] sm:$0xf]  ;;  %v31_v3 = vld [vmem:[%s332_s1 + $0x80] sm:$0xf]  ;;  %224 = vset.pattern.permute.xlu1 %v230_v37  ;;  %225 = vset.pattern.permute.xlu2 %v232_v53 }
   0x2   :  { %v29_v1 = vld [vmem:[%s332_s1 + $0x70] sm:$0xff]  ;;  %216 = vmatpush.msk.msra.mxu2 %vm39_vm0, %v33_v0  ;;  %218 = vmatpush.msk.msra.mxu3 %vm39_vm0, %v34_v2  ;;  %v32_v4 = vld [vmem:[%s332_s1 + $0x88] sm:$0xf]  ;;  %v30_v6 = vld [vmem:[%s332_s1 + $0x78] sm:$0xff]  ;;  %v233_v54 = vmov 2  }
   0x3   :  { %v25_v5 = vld [vmem:[%s332_s1 + $0x50] sm:$0xff]  ;;  %212 = vmatpush.msk.msra.mxu0 %vm39_vm0, %v31_v3  ;;  %214 = vmatpush.msk.msra.mxu1 %vm39_vm0, %v32_v4  ;;  %v27_v7 = vld [vmem:[%s332_s1 + $0x60] sm:$0xff]  ;;  %v28_v8 = vld [vmem:[%s332_s1 + $0x68] sm:$0xff] }
   0x4   :  { %104 = vmatpush.msra.mxu2 %v29_v1  ;;  %124 = vmatpush.msra.mxu3 %v30_v6  ;;  %v26_v9 = vld [vmem:[%s332_s1 + $0x58] sm:$0xff]  ;;  %v23_v10 = vld [vmem:[%s332_s1 + $0x40] sm:$0xff]  ;;  %v21_v11 = vld [vmem:[%s332_s1 + $0x30] sm:$0xff] }
   0x5   :  { %64 = vmatpush.msra.mxu0 %v27_v7  ;;  %84 = vmatpush.msra.mxu1 %v28_v8  ;;  %v24_v12 = vld [vmem:[%s332_s1 + $0x48] sm:$0xff]  ;;  %v22_v13 = vld [vmem:[%s332_s1 + $0x38] sm:$0xff]  ;;  %v19_v14 = vld [vmem:[%s332_s1 + $0x20] sm:$0xff] }
   0x6   :  { %105 = vmatpush.msra.mxu2 %v25_v5  ;;  %125 = vmatpush.msra.mxu3 %v26_v9  ;;  %v20_v15 = vld [vmem:[%s332_s1 + $0x28] sm:$0xff]  ;;  %v17_v16 = vld [vmem:[%s332_s1 + $0x10] sm:$0xff]  ;;  %v18_v17 = vld [vmem:[%s332_s1 + $0x18] sm:$0xff] }
   0x7   :  { %65 = vmatpush.msra.mxu0 %v23_v10  ;;  %85 = vmatpush.msra.mxu1 %v24_v12  ;;  %v14_v18 = vld [vmem:[%s333_s0] sm:$0xff]  ;;  %v16_v20 = vld [vmem:[%s332_s1 + $0x8] sm:$0xff] }
   0x8   :  { %106 = vmatpush.msra.mxu2 %v21_v11  ;;  %126 = vmatpush.msra.mxu3 %v22_v13  ;;  %v15_v19 = vld [vmem:[%s332_s1] sm:$0xff] }
   0x9   :  { %66 = vmatpush.msra.mxu0 %v19_v14  ;;  %86 = vmatpush.msra.mxu1 %v20_v15  ;;  %v150_v48 = vld [vmem:[%s334_s2] sm:$0xff] }
   0xa   :  { %107 = vmatpush.msra.mxu2 %v17_v16  ;;  %127 = vmatpush.msra.mxu3 %v18_v17 }
   0xb   :  { %217 = vmatmul.msk.f32.vlgmr.msra.gmra.mxu2 %vm35_vm1, %v14_v18  ;;  %219 = vmatmul.msk.f32.vlgmr.msra.gmra.mxu3 %vm35_vm1, %v14_v18 }
   0xc   :  { %67 = vmatpush.msra.mxu0 %v15_v19  ;;  %87 = vmatpush.msra.mxu1 %v16_v20 }
   0xd   :  { %213 = vmatmul.msk.f32.vlgmr.msra.gmra.mxu0 %vm35_vm1, %v14_v18  ;;  %215 = vmatmul.msk.f32.vlgmr.msra.gmra.mxu1 %vm35_vm1, %v14_v18 }
   0xe   :  { %227 = vset.pattern.permute.xlu0 %v233_v54 }
  0x8a   :  { %v69_v21 = vpop.f32.mrf.mxu0  ;;  %v89_v22 = vpop.f32.mrf.mxu1 }
  0x8b   :  { %v132_v23 = vadd.f32 %v89_v22, %v69_v21  ;;  %v138_v24 = vmul.f32 %v69_v21, %v69_v21  ;;  %v139_v25 = vmul.f32 %v89_v22, %v89_v22 }
  0x8d   :  { %v142_v29 = vadd.f32 %v139_v25, %v138_v24 }
  0x8e   :  { %v109_v26 = vpop.f32.mrf.mxu2  ;;  %v129_v27 = vpop.f32.mrf.mxu3 }
  0x8f   :  { %v133_v28 = vadd.f32 %v132_v23, %v109_v26  ;;  %v140_v30 = vmul.f32 %v109_v26, %v109_v26  ;;  %v141_v32 = vmul.f32 %v129_v27, %v129_v27 }
  0x91   :  { %v134_v31 = vadd.f32 %v133_v28, %v129_v27  ;;  %v143_v33 = vadd.f32 %v142_v29, %v140_v30 }
  0x93   :  { %135 = vadd.xlane.f32.xlu0 %v134_v31  ;;  %v144_v34 = vadd.f32 %v143_v33, %v141_v32 }
  0x9b   :  { %145 = vadd.xlane.f32.xlu0 %v144_v34 }
 0x106   :  { %v136_v35 = vpop.xlane.xlu0 %135 }
 0x107   :  { %v137_v36 = vmul.f32 0.001953125, %v136_v35 }
 0x109   :  { %v148_v39 = vmul.f32 %v137_v36, %v137_v36 }
 0x10e   :  { %v146_v38 = vpop.xlane.xlu0 %145 }
 0x10f   :  { %v147_v40 = vmul.f32 0.001953125, %v146_v38 }
 0x111   :  { %v149_v41 = vsub.f32 %v147_v40, %v148_v39 }
 0x113   :  { %v151_v42 = vadd.f32 1e-05, %v149_v41 }
 0x115   :  { %228 = vrsqrt.f32 %v151_v42  ;;  %vm158_vm3 = vweird.f32 %v151_v42 }
 0x11b   :  { %v229_v43 = vpop.eup %228 }
 0x11c   :  { %v153_v44 = vmul.f32 %v229_v43, %v151_v42  ;;  %vm159_vm2 = vweird.f32 %v229_v43 }
 0x11d   :  { %vm160_vm4 = vmor %vm158_vm3, %vm159_vm2 }
 0x11e   :  { %v154_v45 = vmul.f32 %v229_v43, %v153_v44 }
 0x120   :  { %v155_v46 = vmul.f32 0.5, %v154_v45 }
 0x122   :  { %v156_v47 = vsub.f32 1.5, %v155_v46 }
 0x124   :  { %v157_v49 = vmul.f32 %v229_v43, %v156_v47 }
 0x126   :  { %v161_v50 = vsel %vm160_vm4, %v229_v43, %v157_v49 }
 0x127   :  { %v162_v51 = vmul.f32 %v161_v50, %v150_v48 }
 0x129   :  { %v163_v52 = vmul.f32 %v162_v51, %v137_v36 }
 0x12b   :  { %165 = vrot.lane.b32.xlu1 %v163_v52, %s231_s27 }
 0x133   :  { %171 = vperm.xlu1 %224, %v162_v51  }
 0x19d   :  { %v166_v55 = vpop.permute.xlu1 %165 }
 0x19e   :  { %v168_v56 = vsub.f32 %v150_v48, %v166_v55 }
 0x1a0   :  { %180 = vperm.xlu2 %225, %v168_v56  }
 0x1a5   :  { %v172_v58 = vpop.permute.xlu1 %171 }
 0x1a6   :  { %v174_v59 = vmul.f32 %v172_v58, %v69_v21  ;;  %v175_v60 = vmul.f32 %v172_v58, %v89_v22  ;;  %v176_v61 = vmul.f32 %v172_v58, %v109_v26  ;;  %v177_v62 = vmul.f32 %v172_v58, %v129_v27 }
 0x1a8   :  { %226 = vset.pattern.permute.xlu2 %v233_v54 }
 0x1a9   :  { %193 = vperm.xlu2 %226, %v150_v48  }
 0x1fa   :  { %v181_v57 = vpop.permute.xlu2 %180 }
 0x1fb   :  { %v183_v63 = vadd.f32 %v181_v57, %v174_v59  ;;  %v184_v0 = vadd.f32 %v181_v57, %v175_v60  ;;  %v185_v1 = vadd.f32 %v181_v57, %v176_v61  ;;  %v186_v2 = vadd.f32 %v181_v57, %v177_v62 }
 0x1fd   :  { %vm187_vm5 = vcmp.gt.f32.partialorder %v183_v63, 0.0  ;;  %vm188_vm6 = vcmp.gt.f32.partialorder %v184_v0, 0.0  ;;  %vm189_vm7 = vcmp.gt.f32.partialorder %v185_v1, 0.0  ;;  %vm190_vm8 = vcmp.gt.f32.partialorder %v186_v2, 0.0 }
 0x203   :  { %v194_v3 = vpop.permute.xlu2 %193 }
 0x204   :  { %v196_v4 = vmul.f32 %v194_v3, %v183_v63  ;;  %v197_v5 = vmul.f32 %v194_v3, %v184_v0  ;;  %v198_v6 = vmul.f32 %v194_v3, %v185_v1  ;;  %v199_v7 = vmul.f32 %v194_v3, %v186_v2 }
 0x206   :  { %v200_v8 = vsel %vm187_vm5, %v183_v63, %v196_v4  ;;  %v201_v9 = vsel %vm188_vm6, %v184_v0, %v197_v5  ;;  %v202_v10 = vsel %vm189_vm7, %v185_v1, %v198_v6  ;;  %v203_v11 = vsel %vm190_vm8, %v186_v2, %v199_v7 }
 0x207   :  { %204 = vst [vmem:[%s335_s3] sm:$0xff] %v200_v8 }
 0x208   :  { %205 = vst [vmem:[%s335_s3 + $0x8] sm:$0xff] %v201_v9 }
 0x209   :  { %206 = vst [vmem:[%s335_s3 + $0x10] sm:$0xff] %v202_v10 }
 0x20a   :  { %207 = vst [vmem:[%s335_s3 + $0x18] sm:$0xff] %v203_v11 }

</bundles_post_ra>
